<compile_context>
chip_gen: v7x
topology: tpu7x:2x2x1
jax: 0.10.0
libtpu: 0.0.40
codegen_flags: <defaults>
</compile_context>

<pallas_src>
import math

import jax
import jax.numpy as jnp
from jax.experimental import pallas as pl
from jax.experimental.pallas import tpu as pltpu

_NEG_BIG = -1000000000.0  # matches masked_fill_(-1e9)


# --------------------------------------------------------------------------
# Kernels (scale / -1e9 are Python floats closed over, not array constants).
# --------------------------------------------------------------------------
def _make_masked_kernel(scale):
    def kernel(q_ref, kt_ref, m_ref, o_ref):
        # q_ref: (h, tq, Dk)   kt_ref: (h, Dk, tk)
        # m_ref: (h or 1, tq, tk) int8   o_ref: (h, tq, tk) f32
        q = q_ref[...] * scale  # fold 1/sqrt(d_k) into the small Q tile
        s = jnp.einsum(
            "hqd,hdk->hqk", q, kt_ref[...], preferred_element_type=jnp.float32
        )
        # masked_fill_(attn_mask, -1e9); mask broadcasts over heads if needed.
        o_ref[...] = jnp.where(m_ref[...] != 0, _NEG_BIG, s)

    return kernel


def _make_unmasked_kernel(scale):
    def kernel(q_ref, kt_ref, o_ref):
        q = q_ref[...] * scale
        o_ref[...] = jnp.einsum(
            "hqd,hdk->hqk", q, kt_ref[...], preferred_element_type=jnp.float32
        )

    return kernel


# --------------------------------------------------------------------------
# Tiling helpers.
# --------------------------------------------------------------------------
def _round_up(x, m):
    return ((x + m - 1) // m) * m


def _largest_aligned_divisor(dim, cap, align):
    """Largest t <= cap with t % align == 0 and dim % t == 0; None if none."""
    t = (min(cap, dim) // align) * align
    while t >= align:
        if dim % t == 0:
            return t
        t -= align
    return None


def _choose_tiling(dim, cap, align):
    """Return (padded_dim, tile).

    Full-dim blocks when dim <= cap (always a legal Pallas block extent);
    otherwise the largest aligned divisor <= cap; pad up to `align` only when
    no such divisor exists (never silently exceeds the VMEM budget)."""
    if dim <= cap:
        return dim, dim
    t = _largest_aligned_divisor(dim, cap, align)
    if t is not None:
        return dim, t
    pdim = _round_up(dim, align)
    t = _largest_aligned_divisor(pdim, cap, align)
    return pdim, (t if t is not None else align)


def _vmem_capacity_bytes():
    """Physical VMEM per TensorCore (128 MiB v5e/v6e, 64 MiB v7x)."""
    try:
        cap = getattr(pltpu.get_tpu_info(), "vmem_capacity_bytes", None)
        if cap:
            return int(cap)
    except Exception:
        pass
    return 64 * 1024 * 1024  # conservative (v7x per-core) fallback


# --------------------------------------------------------------------------
# Wrapper.
# --------------------------------------------------------------------------
def sscaled_dot_product_attention(Q, K, attn_mask=None):
    """Q:[B,H,Lq,Dk], K:[B,H,Lk,Dk]; attn_mask broadcastable to [B,H,Lq,Lk]."""
    B, H, Lq, Dk = Q.shape
    Lk = K.shape[2]
    scale = 1.0 / math.sqrt(Dk)
    has_mask = attn_mask is not None

    # ---- Generation-aware VMEM budgeting --------------------------------
    vmem_cap = _vmem_capacity_bytes()
    vmem_limit = min((vmem_cap * 3) // 4, 128 * 1024 * 1024)      # scoped limit
    budget = min((vmem_cap * 3) // 10, 32 * 1024 * 1024)          # single-buffer WS

    in_bytes = jnp.dtype(Q.dtype).itemsize
    mask_bytes = 1 if has_mask else 0

    def per_head_bytes(tq, tk):
        return (tq * Dk + Dk * tk) * in_bytes + tq * tk * (4 + mask_bytes)

    # Lane/sublane-friendly tiles over the (Lq, Lk) score plane.
    tq_cap, tk_cap = 1024, 2048
    while True:
        Lq_pad, tq = _choose_tiling(Lq, tq_cap, 8)
        Lk_pad, tk = _choose_tiling(Lk, tk_cap, 128)
        if per_head_bytes(tq, tk) <= budget or (tq_cap <= 8 and tk_cap <= 128):
            break
        if tq_cap > 8:
            tq_cap = max(8, tq_cap // 2)
        else:
            tk_cap = max(128, tk_cap // 2)

    # Heads per grid step: as many as the single-buffer budget allows ...
    per_head = per_head_bytes(tq, tk)
    h_tile = 1
    for d in range(1, H + 1):
        if H % d == 0 and d * per_head <= budget:
            h_tile = d

    # ... but keep >=2 grid steps (v7x megacore: 2 TensorCores shard the
    # "parallel" axes) and prefer >=8 when per-step tiles are big enough that
    # the ~0.35us per-step overhead is negligible.
    def total_steps(ht):
        return B * (H // ht) * (Lq_pad // tq) * (Lk_pad // tk)

    while h_tile > 1 and (
        total_steps(h_tile) < 2
        or (total_steps(h_tile) < 8 and h_tile * per_head > (1 << 20))
    ):
        h_tile = max(d for d in range(1, h_tile) if H % d == 0)

    grid = (B, H // h_tile, Lq_pad // tq, Lk_pad // tk)

    # ---- Inputs (pad only when tiling legality demands it) --------------
    q_in = Q
    if Lq_pad != Lq:
        q_in = jnp.pad(Q, ((0, 0), (0, 0), (0, Lq_pad - Lq), (0, 0)))
    # Pre-transpose K -> [B,H,Dk,Lk] for contiguous K-tile DMAs and native
    # MXU [K,N] feeding (no in-kernel XLU transpose).
    kt = jnp.swapaxes(K, -1, -2)
    if Lk_pad != Lk:
        kt = jnp.pad(kt, ((0, 0), (0, 0), (0, 0), (0, Lk_pad - Lk)))

    # Q index_map is constant in the innermost (j) axis -> Pallas elides the
    # Q re-DMA across the Lk loop.  Keep j innermost.
    q_spec = pl.BlockSpec((None, h_tile, tq, Dk), lambda b, h, i, j: (b, h, i, 0))
    k_spec = pl.BlockSpec((None, h_tile, Dk, tk), lambda b, h, i, j: (b, h, 0, j))
    o_spec = pl.BlockSpec((None, h_tile, tq, tk), lambda b, h, i, j: (b, h, i, j))

    compiler_params = pltpu.CompilerParams(
        dimension_semantics=("parallel", "parallel", "parallel", "parallel"),
        vmem_limit_bytes=vmem_limit,
    )
    out_shape = jax.ShapeDtypeStruct((B, H, Lq_pad, Lk_pad), jnp.float32)

    if not has_mask:
        out = pl.pallas_call(
            _make_unmasked_kernel(scale),
            out_shape=out_shape,
            grid_spec=pltpu.PrefetchScalarGridSpec(
                num_scalar_prefetch=0,
                grid=grid,
                in_specs=[q_spec, k_spec],
                out_specs=o_spec,
            ),
            compiler_params=compiler_params,
        )(q_in, kt)
        if (Lq_pad, Lk_pad) != (Lq, Lk):
            out = out[:, :, :Lq, :Lk]
        return out

    # ---- Mask: broadcast via index_map, never materialized --------------
    mask = attn_mask
    if mask.ndim < 4:
        mask = mask.reshape((1,) * (4 - mask.ndim) + mask.shape)
    mb, mh = mask.shape[0], mask.shape[1]
    if mb not in (1, B) or mh not in (1, H):
        mask = jnp.broadcast_to(mask, (B, H) + mask.shape[2:])  # rare fallback
        mb, mh = B, H
    if mask.shape[2:] != (Lq, Lk):
        mask = jnp.broadcast_to(mask, (mb, mh, Lq, Lk))
    mask_i8 = mask.astype(jnp.int8)  # 1 B/elem mask stream (cheap single pass)
    if (Lq_pad, Lk_pad) != (Lq, Lk):
        mask_i8 = jnp.pad(
            mask_i8, ((0, 0), (0, 0), (0, Lq_pad - Lq), (0, Lk_pad - Lk))
        )

    mh_blk = h_tile if mh == H else 1
    if mb == B and mh == H:
        m_idx = lambda b, h, i, j: (b, h, i, j)
    elif mb == B:
        m_idx = lambda b, h, i, j: (b, 0, i, j)
    elif mh == H:
        m_idx = lambda b, h, i, j: (0, h, i, j)
    else:
        m_idx = lambda b, h, i, j: (0, 0, i, j)
    m_spec = pl.BlockSpec((None, mh_blk, tq, tk), m_idx)

    out = pl.pallas_call(
        _make_masked_kernel(scale),
        out_shape=out_shape,
        grid_spec=pltpu.PrefetchScalarGridSpec(
            num_scalar_prefetch=0,
            grid=grid,
            in_specs=[q_spec, k_spec, m_spec],
            out_specs=o_spec,
        ),
        compiler_params=compiler_params,
    )(q_in, kt, mask_i8)
    if (Lq_pad, Lk_pad) != (Lq, Lk):
        out = out[:, :, :Lq, :Lk]
    return out


if __name__ == "__main__":
    # Small deterministic shapes consistent with the module's forward:
    # Q: [batch, heads, len_q, d_k], K: [batch, heads, len_k, d_k]
    B, H, Lq, Lk, Dk = 2, 4, 8, 8, 32

    key = jax.random.PRNGKey(0)
    kq, kk, km = jax.random.split(key, 3)
    Q = jax.random.normal(kq, (B, H, Lq, Dk), dtype=jnp.float32)
    K = jax.random.normal(kk, (B, H, Lk, Dk), dtype=jnp.float32)
    attn_mask = jax.random.bernoulli(km, p=0.25, shape=(B, H, Lq, Lk))

    ref_scores = jnp.matmul(Q, jnp.swapaxes(K, -1, -2)) / jnp.float32(math.sqrt(Dk))

    # Full [B,H,Lq,Lk] mask.
    out = jax.block_until_ready(sscaled_dot_product_attention(Q, K, attn_mask))
    ref = jnp.where(attn_mask, jnp.float32(_NEG_BIG), ref_scores)
    assert out.shape == (B, H, Lq, Lk)
    assert jnp.allclose(out, ref, atol=1e-4, rtol=1e-4)

    # Head-broadcast mask [B,1,Lq,Lk] (exercises the index_map broadcast path).
    mask_b1 = attn_mask[:, :1]
    out_b1 = jax.block_until_ready(sscaled_dot_product_attention(Q, K, mask_b1))
    ref_b1 = jnp.where(mask_b1, jnp.float32(_NEG_BIG), ref_scores)
    assert jnp.allclose(out_b1, ref_b1, atol=1e-4, rtol=1e-4)

    # attn_mask=None path (module allows it).
    out2 = jax.block_until_ready(sscaled_dot_product_attention(Q, K, None))
    assert jnp.allclose(out2, ref_scores, atol=1e-4, rtol=1e-4)

    print("KERNEL_OK")
</pallas_src>

<mosaic_0001>
module attributes {stable_mosaic.version = 11 : i64} {
  func.func @kernel(%arg0: i32, %arg1: i32, %arg2: i32, %arg3: i32, %arg4: memref<1x4x8x32xf32, #tpu.memory_space<vmem>>, %arg5: memref<1x4x32x8xf32, #tpu.memory_space<vmem>>, %arg6: memref<1x4x8x8xi8, #tpu.memory_space<vmem>>, %arg7: memref<1x4x8x8xf32, #tpu.memory_space<vmem>>) attributes {dimension_semantics = [#tpu.dimension_semantics<parallel>, #tpu.dimension_semantics<parallel>, #tpu.dimension_semantics<parallel>, #tpu.dimension_semantics<parallel>], iteration_bounds = array<i64: 2, 1, 1, 1>, scalar_prefetch = 0 : i64, scratch_operands = 0 : i64, tpu.core_type = #tpu.core_type<tc>, window_params = [{transform_indices = @transform_0, window_bounds = array<i64: 1, 4, 8, 32>}, {transform_indices = @transform_1, window_bounds = array<i64: 1, 4, 32, 8>}, {transform_indices = @transform_2, window_bounds = array<i64: 1, 4, 8, 8>}, {transform_indices = @transform_3, window_bounds = array<i64: 1, 4, 8, 8>}]} {
    %c0 = arith.constant 0 : index
    %c0_0 = arith.constant 0 : index
    %c0_1 = arith.constant 0 : index
    %c0_2 = arith.constant 0 : index
    %0 = vector.load %arg4[%c0, %c0_0, %c0_1, %c0_2] : memref<1x4x8x32xf32, #tpu.memory_space<vmem>>, vector<1x4x8x32xf32>
    %1 = vector.shape_cast %0 : vector<1x4x8x32xf32> to vector<4x8x32xf32>
    %cst = arith.constant 0.176776692 : f32
    %2 = vector.broadcast %cst : f32 to vector<4x8x32xf32>
    %3 = arith.mulf %1, %2 : vector<4x8x32xf32>
    %c0_3 = arith.constant 0 : index
    %c0_4 = arith.constant 0 : index
    %c0_5 = arith.constant 0 : index
    %c0_6 = arith.constant 0 : index
    %4 = vector.load %arg5[%c0_3, %c0_4, %c0_5, %c0_6] : memref<1x4x32x8xf32, #tpu.memory_space<vmem>>, vector<1x4x32x8xf32>
    %5 = vector.shape_cast %4 : vector<1x4x32x8xf32> to vector<4x32x8xf32>
    "tpu.trace_start"() <{level = 10 : i32, message = "hqd,hdk->hqk"}> : () -> ()
    %cst_7 = arith.constant dense<0.000000e+00> : vector<4x8x8xf32>
    %6 = tpu.matmul %3, %5, %cst_7 {dimension_numbers = #tpu.dot_dimension_numbers<[2], [1], [1], [2], [0, 0, 0, 1, 1, 2], [0], [0]>} : vector<4x8x32xf32>, vector<4x32x8xf32>, vector<4x8x8xf32> -> vector<4x8x8xf32>
    "tpu.trace_stop"() : () -> ()
    %c0_8 = arith.constant 0 : index
    %c0_9 = arith.constant 0 : index
    %c0_10 = arith.constant 0 : index
    %c0_11 = arith.constant 0 : index
    %7 = vector.load %arg6[%c0_8, %c0_9, %c0_10, %c0_11] : memref<1x4x8x8xi8, #tpu.memory_space<vmem>>, vector<1x4x8x8xi8>
    %8 = vector.shape_cast %7 : vector<1x4x8x8xi8> to vector<4x8x8xi8>
    %c0_i8 = arith.constant 0 : i8
    %9 = vector.broadcast %c0_i8 : i8 to vector<4x8x8xi8>
    %10 = arith.cmpi ne, %8, %9 : vector<4x8x8xi8>
    %cst_12 = arith.constant -1.000000e+09 : f32
    %11 = vector.broadcast %cst_12 : f32 to vector<4x8x8xf32>
    %12 = arith.select %10, %11, %6 : vector<4x8x8xi1>, vector<4x8x8xf32>
    %c0_13 = arith.constant 0 : index
    %c0_14 = arith.constant 0 : index
    %c0_15 = arith.constant 0 : index
    %c0_16 = arith.constant 0 : index
    %13 = vector.load %arg7[%c0_13, %c0_14, %c0_15, %c0_16] : memref<1x4x8x8xf32, #tpu.memory_space<vmem>>, vector<1x4x8x8xf32>
    %14 = vector.shape_cast %13 : vector<1x4x8x8xf32> to vector<4x8x8xf32>
    %15 = vector.shape_cast %12 : vector<4x8x8xf32> to vector<1x4x8x8xf32>
    tpu.vector_store %arg7[%c0_13, %c0_14, %c0_15, %c0_16], %15 {strides = array<i32>} : memref<1x4x8x8xf32, #tpu.memory_space<vmem>>, vector<1x4x8x8xf32>,
    return
  }
  func.func @transform_0(%arg0: i32, %arg1: i32, %arg2: i32, %arg3: i32) -> (i32, i32, i32, i32) {
    %c0_i32 = arith.constant 0 : i32
    %c0_i32_0 = arith.constant 0 : i32
    return %arg0, %arg1, %arg2, %c0_i32 : i32, i32, i32, i32
  }
  func.func @transform_1(%arg0: i32, %arg1: i32, %arg2: i32, %arg3: i32) -> (i32, i32, i32, i32) {
    %c0_i32 = arith.constant 0 : i32
    %c0_i32_0 = arith.constant 0 : i32
    return %arg0, %arg1, %c0_i32, %arg3 : i32, i32, i32, i32
  }
  func.func @transform_2(%arg0: i32, %arg1: i32, %arg2: i32, %arg3: i32) -> (i32, i32, i32, i32) {
    %c0_i32 = arith.constant 0 : i32
    return %arg0, %arg1, %arg2, %arg3 : i32, i32, i32, i32
  }
  func.func @transform_3(%arg0: i32, %arg1: i32, %arg2: i32, %arg3: i32) -> (i32, i32, i32, i32) {
    %c0_i32 = arith.constant 0 : i32
    return %arg0, %arg1, %arg2, %arg3 : i32, i32, i32, i32
  }
}

</mosaic_0001>

<bundles_post_ra>
// kernel: tpu_custom_call.1
= control target key start
LH: loop header
LB: loop body
LE: loop exit
PB: predicated region body
PF: predicated region fallthrough
CT: control target
= control target key end

     0   :  { %8 = vsyncpa [#allocation3], 0  ;;  %s1288_s0 = inlined_call_operand.vmem [shape: f32[2,4,8,32], index: 0, kind: input, shape index: {}]   ;;  %s1289_s1 = inlined_call_operand.vmem [shape: f32[2,4,32,8], index: 1, kind: input, shape index: {}]   ;;  %s1290_s2 = inlined_call_operand.vmem [shape: s8[2,4,8,8], index: 2, kind: input, shape index: {}]   ;;  %s1291_s3 = inlined_call_operand.hbm [shape: f32[2,4,8,8], index: 3, kind: output, shape index: {}]  }
   0x1   :  { %10 = vsyncpa [#allocation3 + $0x1], 0  ;;  %s1122_s12 = smov 0   ;;  %s1124_s13 = smov 0  }
   0x2   :  { %s1126_s14 = smov 0   ;;  %s1128_s15 = smov 0  }
   0x3   :  { %s1130_s16 = smov 0   ;;  %s1132_s17 = smov 0  }
   0x4 LB: > { %s841_s18 = sadd.s32 4294967295, %s1093_s17   ;;  %s842_s19 = sadd.s32 4294967294, %s1093_s17   ;;  %s1093_s17 = sphi %s1132_s17, %s16_s17   ;;  %s1089_s16 = sphi %s1130_s16, %s1298_s16   ;;  %s1085_s15 = sphi %s1128_s15, %s1297_s15   ;;  %s1081_s14 = sphi %s1126_s14, %s1296_s14   ;;  %s1077_s13 = sphi %s1124_s13, %s1295_s13   ;;  %s1073_s12 = sphi %s1122_s12, %s1294_s12  }
   0x5   : > { %s42_s20 = sadd.s32 1, %s1089_s16  ;;  %s147_s21 = sadd.s32 1, %s1081_s14 }
   0x6   : > { %p44_p0 = scmp.ge.s32.totalorder %s42_s20, 2  ;;  %p157_p1 = scmp.ne.s32.totalorder %s1081_s14, %s1077_s13 }
   0x7   : > { %p158_p2 = scmp.eq.s32.totalorder %s841_s18, 1  ;;  %p163_p3 = scmp.ne.s32.totalorder %s1077_s13, %s1073_s12 }
   0x8   : > { %s1300_s20 = smov (%p44_p0, %s42_s20), 0  ;;  %p164_p5 = scmp.eq.s32.totalorder %s842_s19, 1 }
   0x9   : > { %p1162_p4 = por %p158_p2, %p157_p1  ;;  %s138_s23 = ssub.s32 %s1089_s16, %s1300_s20 }
   0xa   : > { %p845_p6 = scmp.ge.s32.totalorder %s1093_s17, 1  ;;  %p145_p7 = scmp.eq.s32.totalorder %s138_s23, 0 }
   0xb   : > { %p1169_p8 = por %p164_p5, %p163_p3  ;;  %p234_p9 = scmp.lt.s32.totalorder %s1093_s17, 3 }
   0xc   : > { %s1175_s25 = scalar_select %p145_p7, %s1081_s14, %s147_s21  }
   0xd   : > { %p235_p10 = pnand %p845_p6, %p234_p9 }
   0xe   : > { %p294_p11 = scmp.lt.s32.totalorder (!%p235_p10), %s1085_s15, 1  ;;  %v1095_v0 = vmov (!%p235_p10), 0.0|0.0   ;;  %vm1096_vm0 = vmmov (!%p235_p10), 0   ;;  %v1097_v1 = vmov (!%p235_p10), 0.0   ;;  %vm363_vm1 = vcmask (!%p235_p10), 261120   ;;  %s290_s18 = sand.u32 (!%p235_p10), 1, %s1077_s13  }
   0xf   : > { %238 = sbr.rel (%p235_p10) target bundleno = 273 (0x111), region = 32  ;;  %930 = vmatprep.subr.bf16.mxu0 (!%p235_p10), %v1095_v0  ;;  %936 = vmatprep.subr.bf16.mxu1 (!%p235_p10), %v1095_v0  ;;  %v1098_v36 = vmov (!%p235_p10), 0   ;;  %s846_s19 = sshll.u32 (!%p235_p10), %s290_s18, 5  ;;  %vm680_vm7 = vcmask (!%p235_p10), 64512  }
  0x10   : > { %894 = vmatprep.mubr.msk.f32.mxu0 (!%p235_p10), %vm1096_vm0, %v1097_v1  ;;  %905 = vmatprep.mubr.msk.f32.mxu1 (!%p235_p10), %vm1096_vm0, %v1097_v1  ;;  %s292_s21 = scalar_lea.vmem (!%p235_p10), [#allocation2], %s846_s19 }
  0x11   : > { %s703_s23 = sshll.u32 (!%p235_p10), %s292_s21, 4  ;;  %s1231_s23 = int_to_ptr.vmem [resolvable:$true] %s703_s23 }
  0x12   : > { %s1015_s30 = scalar_lea.vmem (!%p235_p10), %s1231_s23, 512 }
  0x13   : > { %p1016_p12 = scmp.ne.s32.totalorder (!%p235_p10), %s1231_s23, %s1015_s30 }
  0x15   : > { %p1017_p13 = pnand (!%p235_p10), %p1016_p12, %p1162_p4 }
  0x16   : > { %s1179_s26 = scalar_select %p294_p11, %s1085_s15, 1 }
  0x17   : > { %p1018_p0 = pneg %p1017_p13 }
  0x18   : > { %s863_s27 = sshll.u32 %s1179_s26, 7  ;;  %s862_s28 = sshll.u32 %s1179_s26, 5 }
  0x19   : > { %s1188_s4 = scalar_lea.vmem %s1289_s1, %s863_s27  ;;  %s1196_s7 = scalar_lea.vmem %s1288_s0, %s862_s28 }
  0x1a   : > { %v347_v2 = vld [vmem:[%s1188_s4] sm:$0xff]  ;;  %v348_v3 = vld [vmem:[%s1188_s4 + $0x8] sm:$0xff]  ;;  %v349_v7 = vld [vmem:[%s1188_s4 + $0x10] sm:$0xff]  ;;  %s864_s8 = sshll.u32 %s1179_s26, 3  ;;  %s865_s26 = sshll.u32 %s1085_s15, 9 }
  0x1b   : > { %v351_v4 = vld [vmem:[%s1188_s4 + $0x20] sm:$0xff]  ;;  %v931_v5 = vpack.c.bf16 %v348_v3, %v347_v2  ;;  %v352_v6 = vld [vmem:[%s1188_s4 + $0x28] sm:$0xff]  ;;  %v350_v8 = vld [vmem:[%s1188_s4 + $0x18] sm:$0xff]  ;;  %s334_s11 = scalar_lea.vmem %s1290_s2, %s864_s8  ;;  %s1236_s29 = scalar_lea.hbm %s1291_s3, %s865_s26 }
  0x1c   : > { %v937_v9 = vpack.c.bf16 %v352_v6, %v351_v4  ;;  %v353_v10 = vld [vmem:[%s1188_s4 + $0x30] sm:$0xff]  ;;  %v354_v11 = vld [vmem:[%s1188_s4 + $0x38] sm:$0xff]  ;;  %v934_v12 = vpack.c.bf16 %v350_v8, %v349_v7  ;;  %v339_v13 = vld [vmem:[%s1196_s7] sm:$0xff]  ;;  %s1242_s15 = scalar_lea.sflag [#allocation3], %s290_s18 }
  0x1d   : > { %932 = vmatpush3.bf16.msra.mxu0 %v931_v5  ;;  %v940_v14 = vpack.c.bf16 %v354_v11, %v353_v10  ;;  %v340_v15 = vld [vmem:[%s1196_s7 + $0x8] sm:$0xff]  ;;  %v355_v16 = vld [vmem:[%s1188_s4 + $0x40] sm:$0xff]  ;;  %v343_v20 = vmul.f32 0.17677669, %v339_v13  ;;  %v357_v24 = vld [vmem:[%s1188_s4 + $0x50] sm:$0xff] }
  0x1e   : > { %938 = vmatpush3.bf16.msra.mxu1 %v937_v9  ;;  %933 = vmatprep.subr.bf16.mxu0 %v1095_v0  ;;  %v356_v17 = vld [vmem:[%s1188_s4 + $0x48] sm:$0xff]  ;;  %v359_v18 = vld [vmem:[%s1188_s4 + $0x60] sm:$0xff]  ;;  %v344_v21 = vmul.f32 0.17677669, %v340_v15  ;;  %v358_v25 = vld [vmem:[%s1188_s4 + $0x58] sm:$0xff] }
  0x1f   : > { %939 = vmatprep.subr.bf16.mxu1 %v1095_v0  ;;  %v360_v19 = vld [vmem:[%s1188_s4 + $0x68] sm:$0xff]  ;;  %v943_v22 = vpack.c.bf16 %v356_v17, %v355_v16  ;;  %v361_v26 = vld [vmem:[%s1188_s4 + $0x70] sm:$0xff]  ;;  %v362_v27 = vld [vmem:[%s1188_s4 + $0x78] sm:$0xff]  ;;  %v946_v28 = vpack.c.bf16 %v358_v25, %v357_v24  ;;  %s1099_s4 = smov [#allocation2]  }
  0x20   : > { %v949_v23 = vpack.c.bf16 %v360_v19, %v359_v18  ;;  %v341_v29 = vld [vmem:[%s1196_s7 + $0x10] sm:$0xff]  ;;  %v952_v30 = vpack.c.bf16 %v362_v27, %v361_v26  ;;  %v342_v31 = vld [vmem:[%s1196_s7 + $0x18] sm:$0xff]  ;;  %v656_v34 = vld [vmem:[%s334_s11] sm:$0x3]  ;;  %s1019_s5 = sshll.u32 %s1099_s4, 4  ;;  %s1020_s5 = int_to_ptr.vmem [resolvable:$false] %s1019_s5 }
  0x21   : > { %935 = vmatpush3.bf16.msra.mxu0 %v934_v12  ;;  %v345_v32 = vmul.f32 0.17677669, %v341_v29  ;;  %v346_v33 = vmul.f32 0.17677669, %v342_v31  ;;  %v657_v35 = vld [vmem:[%s334_s11 + $0x2] sm:$0x3]  ;;  %vm660_vm2 = vnez %v656_v34  ;;  %p1022_p1 = scmp.lt.s32.totalorder %s1231_s23, %s1020_s5 }
  0x22   : > { %941 = vmatpush3.bf16.msra.mxu1 %v940_v14  ;;  %942 = vmatprep.subr.bf16.mxu0 %v1095_v0  ;;  %vm661_vm3 = vnez %v657_v35  ;;  %v664_v37 = vsel %vm660_vm2, 16843009, %v1098_v36  ;;  %v658_v39 = vld [vmem:[%s334_s11 + $0x4] sm:$0x3]  ;;  %v659_v41 = vld [vmem:[%s334_s11 + $0x6] sm:$0x3] }
  0x23   : > { %948 = vmatprep.subr.bf16.mxu1 %v1095_v0  ;;  %v665_v38 = vsel %vm661_vm3, 16843009, %v1098_v36  ;;  %v668_v40 = vunpack.c.0.s8 %v664_v37  ;;  %vm662_vm4 = vnez %v658_v39  ;;  %vm663_vm5 = vnez %v659_v41  ;;  %s1021_s6 = scalar_lea.vmem %s1020_s5, 1024 }
  0x24   : > { %895 = vmatmul.mubr.msk.f32.vlgmr.msra.gmra.mrb[0].mxu0 %vm363_vm1, %v343_v20  ;;  %v669_v42 = vunpack.c.0.s8 %v665_v38  ;;  %v666_v43 = vsel %vm662_vm4, 16843009, %v1098_v36  ;;  %v667_v45 = vsel %vm663_vm5, 16843009, %v1098_v36  ;;  %p1023_p2 = scmp.lt.s32.totalorder %s1021_s6, %s1015_s30 }
  0x25   : > { %906 = vmatmul.mubr.msk.f32.vlgmr.msra.gmra.mrb[0].mxu1 %vm363_vm1, %v344_v21  ;;  %944 = vmatpush3.bf16.msra.mxu0 %v943_v22  ;;  %vm672_vm6 = vcmp.ne.s32.totalorder %v668_v40, 0  ;;  %v670_v51 = vunpack.c.0.s8 %v666_v43  ;;  %v671_v52 = vunpack.c.0.s8 %v667_v45 }
  0x26   : > { %950 = vmatpush3.bf16.msra.mxu1 %v949_v23  ;;  %945 = vmatprep.subr.bf16.mxu0 %v1095_v0  ;;  %vm673_vm8 = vcmp.ne.s32.totalorder %v669_v42, 0  ;;  %p1024_p3 = por %p1023_p2, %p1022_p1 }
  0x27   : > { %951 = vmatprep.subr.bf16.mxu1 %v1095_v0  ;;  %916 = vmatprep.mubr.msk.f32.mxu0 %vm1096_vm0, %v1097_v1  ;;  %vm674_vm9 = vcmp.ne.s32.totalorder %v670_v51, 0  ;;  %vm675_vm10 = vcmp.ne.s32.totalorder %v671_v52, 0 }
  0x28   : > { %927 = vmatprep.mubr.msk.f32.mxu1 %vm1096_vm0, %v1097_v1  ;;  %p1025_p5 = pnand %p1024_p3, %p1018_p0 }
  0x29   : > { %947 = vmatpush3.bf16.msra.mxu0 %v946_v28 }
  0x2a   : > { %953 = vmatpush3.bf16.msra.mxu1 %v952_v30 }
  0x2c   : > { %917 = vmatmul.mubr.msk.f32.vlgmr.msra.gmra.mrb[2].mxu0 %vm363_vm1, %v345_v32 }
  0x2d   : > { %928 = vmatmul.mubr.msk.f32.vlgmr.msra.gmra.mrb[2].mxu1 %vm363_vm1, %v346_v33 }
  0xf7   : > { %v433_v44 = vpop.f32.mrb[0].mxu0 }
  0xf8   : > { %v676_v46 = vsel %vm672_vm6, -1e+09, %v433_v44  ;;  %v506_v47 = vpop.f32.mrb[0].mxu1  ;;  %v896_v48 = vpop.f32.mrb[1].mxu0 }
  0xf9   : > { %681 = vst.msk [vmem:[%s292_s21] sm:$0xff] %vm680_vm7, %v676_v46  ;;  %v677_v49 = vsel %vm673_vm8, -1e+09, %v506_v47  ;;  %v907_v50 = vpop.f32.mrb[1].mxu1 }
  0xfa   : > { %682 = vst.msk [vmem:[%s292_s21 + $0x8] sm:$0xff] %vm680_vm7, %v677_v49 }
  0xff   : > { %v579_v53 = vpop.f32.mrb[2].mxu0 }
 0x100   : > { %v678_v54 = vsel %vm674_vm9, -1e+09, %v579_v53  ;;  %v652_v55 = vpop.f32.mrb[2].mxu1  ;;  %v918_v56 = vpop.f32.mrb[3].mxu0 }
 0x101   : > { %683 = vst.msk [vmem:[%s292_s21 + $0x10] sm:$0xff] %vm680_vm7, %v678_v54  ;;  %v679_v57 = vsel %vm675_vm10, -1e+09, %v652_v55  ;;  %v929_v58 = vpop.f32.mrb[3].mxu1 }
 0x102   : > { %684 = vst.msk [vmem:[%s292_s21 + $0x18] sm:$0xff] %vm680_vm7, %v679_v57 }
 0x103   : > { %1028 = shalt.err (!%p1025_p5)
}
 0x104   : > { %s1029_s7 = scalar_lea.hbm %s1236_s29, 512  ;;  %s1033_s10 = scalar_lea.hbm %s1291_s3, 1024 }
 0x105   : > { %p1030_p6 = scmp.ne.s32.totalorder %s1236_s29, %s1029_s7  ;;  %p1034_p10 = scmp.lt.u32.totalorder %s1236_s29, %s1291_s3 }
 0x106   : > { %p1035_p11 = scmp.lt.u32.totalorder %s1033_s10, %s1029_s7  ;;  %p1037_p13 = scmp.lt.u32.totalorder %s1029_s7, %s1236_s29 }
 0x107   : > { %p1031_p7 = pnand %p1030_p6, %p1162_p4 }
 0x108   : > { %p1036_p12 = por %p1035_p11, %p1034_p10 }
 0x109   : > { %p1032_p9 = pneg %p1031_p7 }
 0x10a   : > { %p1038_p0 = por %p1037_p13, %p1036_p12 }
 0x10c   : > { %p1039_p1 = pnand %p1038_p0, %p1032_p9 }
 0x10e   : > { %1042 = shalt.err (!%p1039_p1)
}
 0x10f   : > { %s1100_s19 = smov 128   ;;  %s1101_s21 = smov 8  }
 0x110   : > { %954 = dma.vmem_to_hbm [thread:$0]  (%p1162_p4), %s1231_s23, 512, %s1236_s29, %s1242_s15, %s1100_s19, %s1100_s19, %s1101_s21  }
 0x111 PF: > { %p960_p2 = scmp.ge.s32.totalorder %s1093_s17, 2  ;;  %s718_s26 = sand.u32 1, %s1073_s12  }
 0x112   : > { %s719_s27 = scalar_lea.sflag [#allocation3], %s718_s26 }
 0x113   : > { %p957_p3 = pnand %p960_p2, %p1169_p8 }
 0x115   : > { %1068 = dma.done.wait (!%p957_p3), %s719_s27, 512  }
 0x116   : > { %1070 = vsyncadd (!%p957_p3), %s719_s27, 4294966784  ;;  %s16_s17 = sadd.s32 1, %s1093_s17   ;;  %s1294_s12 = smov %s1077_s13 }
 0x117   : > { %p13_p5 = scmp.ge.s32.totalorder %s16_s17, 4   ;;  %s1295_s13 = smov %s1081_s14 }
 0x118   : > { %s1296_s14 = smov %s1175_s25  ;;  %s1297_s15 = smov %s1089_s16 }
 0x119   : > { %s1298_s16 = smov %s1300_s20  ;;  %15 = sbr.rel (!%p13_p5) target bundleno = 4 (0x4), region = 73 }
 0x120   :  { %724 = vsyncpa [#allocation3], 1 }
 0x121   :  { %726 = vsyncpa [#allocation3 + $0x1], 1 }

</bundles_post_ra>
